<compile_context>
chip_gen: v7x
topology: tpu7x:2x2x1
jax: 0.10.0
libtpu: 0.0.40
codegen_flags: <defaults>
</compile_context>

<pallas_src>
import jax
import jax.numpy as jnp
from jax.experimental import pallas as pl
from jax.experimental.pallas import tpu as pltpu


def _attn_pool_kernel(x_ref, w1_ref, b1_ref, w2_ref, o_ref):
    # x_ref : (TB, S, H) f32   batch tile
    # w1_ref: (H, H)   bf16    first Linear weight (pre-transposed, pre-cast)
    # b1_ref: (1, H)   f32     first Linear bias
    # w2_ref: (1, H)   f32     second Linear weight as a row vector
    # o_ref : (TB, 1, H) f32
    TB, S, H = x_ref.shape
    x = x_ref[...]                                              # (TB, S, H) f32

    # Linear(H, H): one big (TB*S, H) @ (H, H) MXU matmul, bf16 operands,
    # f32 accumulation; tanh goes to the EUP.
    x2d = x.reshape(TB * S, H)
    h = jnp.tanh(
        jnp.dot(x2d.astype(jnp.bfloat16), w1_ref[...],
                preferred_element_type=jnp.float32)
        + b1_ref[...]
    )                                                           # (TB*S, H) f32

    # Linear(H, 1): VPU multiply + lane reduction instead of an N=1 MXU matmul.
    # (b2 omitted: softmax(s + b2) == softmax(s).)
    h3 = h.reshape(TB, S, H)
    scores = jnp.sum(h3 * w2_ref[...], axis=-1, keepdims=True)  # (TB, S, 1)

    # Softmax over the sequence axis, per batch element (f32 throughout).
    m = jnp.max(scores, axis=1, keepdims=True)                  # (TB, 1, 1)
    e = jnp.exp(scores - m)                                     # (TB, S, 1)
    attn = e * pl.reciprocal(jnp.sum(e, axis=1, keepdims=True), approx=True)

    # Weighted sum over the sequence: (x * attn_weights).sum(dim=1).
    o_ref[...] = jnp.sum(x * attn, axis=1, keepdims=True)       # (TB, 1, H)


def _pick_batch_tile(B, max_tb=32):
    # Largest divisor of B that is <= max_tb: amortizes the ~0.35 us/grid-step
    # overhead and fills the MXU M dimension with TB*S rows.
    return max(tb for tb in range(1, min(B, max_tb) + 1) if B % tb == 0)


def attention_pooling(x, w1, b1, w2, b2=None, *, max_tb=32):
    """x: (B, S, H) f32; w1: (H, H) (for x @ w1); b1: (H,); w2: (H, 1) or (H,).

    Returns (B, H) f32, matching AttentionPooling.forward. b2 is accepted for
    API parity but unused inside the kernel: it cancels exactly under softmax.
    """
    B, S, H = x.shape
    TB = _pick_batch_tile(B, max_tb)

    w1_bf16 = w1.astype(jnp.bfloat16)             # halves resident-weight VMEM + DMA
    b1_2d = b1.reshape(1, H).astype(jnp.float32)
    w2_row = w2.reshape(1, H).astype(jnp.float32)

    # Weights/biases are grid-invariant -> single-buffer them (double-buffering
    # a resident weight wastes VMEM for zero pipelining benefit).
    resident = pl.Buffered(1)

    # VMEM note (v7x: 64 MiB phys / 32 MiB default scoped): for large H, the
    # bf16 w1 (H*H*2 bytes, single-buffered) plus the 2x-buffered (TB, S, H)
    # x block must stay under the scoped limit; shrink TB or tile H before
    # raising vmem_limit_bytes.
    out = pl.pallas_call(
        _attn_pool_kernel,
        out_shape=jax.ShapeDtypeStruct((B, 1, H), jnp.float32),
        grid_spec=pltpu.PrefetchScalarGridSpec(
            num_scalar_prefetch=0,
            grid=(B // TB,),
            in_specs=[
                pl.BlockSpec((TB, S, H), lambda g: (g, 0, 0)),                   # x
                pl.BlockSpec((H, H), lambda g: (0, 0), pipeline_mode=resident),  # w1
                pl.BlockSpec((1, H), lambda g: (0, 0), pipeline_mode=resident),  # b1
                pl.BlockSpec((1, H), lambda g: (0, 0), pipeline_mode=resident),  # w2
            ],
            out_specs=pl.BlockSpec((TB, 1, H), lambda g: (g, 0, 0)),
        ),
        compiler_params=pltpu.CompilerParams(
            # Batch tiles are independent -> megacore sharding on v7x
            # (no-op on single-TC v5e/v6e).
            dimension_semantics=("parallel",),
        ),
    )(x, w1_bf16, b1_2d, w2_row)

    return out.reshape(B, H)


def _reference(x, w1, b1, w2, b2):
    # Pure-JAX f32 reference of the PyTorch forward, for a correctness check.
    h = jnp.tanh(x @ w1 + b1)                  # (B, S, H)
    scores = h @ w2 + b2                       # (B, S, 1)
    attn = jax.nn.softmax(scores, axis=1)      # softmax over seq dim
    return jnp.sum(x * attn, axis=1)           # (B, H)


if __name__ == "__main__":
    B, S, H = 8, 8, 256   # hidden_dim=256 as in the PyTorch module

    key = jax.random.PRNGKey(0)
    kx, kw1, kb1, kw2, kb2 = jax.random.split(key, 5)

    x = jax.random.normal(kx, (B, S, H), dtype=jnp.float32)
    # nn.Linear(H, H): weight (H, H), bias (H,); stored transposed for x @ w1.
    w1 = jax.random.normal(kw1, (H, H), dtype=jnp.float32) * 0.05
    b1 = jax.random.normal(kb1, (H,), dtype=jnp.float32) * 0.05
    # nn.Linear(H, 1): weight (1, H) -> stored as (H, 1) for h @ w2.
    w2 = jax.random.normal(kw2, (H, 1), dtype=jnp.float32) * 0.05
    b2 = jax.random.normal(kb2, (1,), dtype=jnp.float32) * 0.05

    out = attention_pooling(x, w1, b1, w2, b2)
    out = jax.block_until_ready(out)

    ref = _reference(x, w1, b1, w2, b2)
    assert out.shape == (B, H)
    # bf16 MXU operands + approx reciprocal -> loosened tolerance vs f32 reference.
    assert jnp.allclose(out, ref, atol=2e-2, rtol=2e-2), "mismatch vs reference"

    print("KERNEL_OK")
</pallas_src>

<mosaic_0001>
module attributes {stable_mosaic.version = 11 : i64} {
  func.func @_attn_pool_kernel(%arg0: i32, %arg1: memref<8x8x256xf32, #tpu.memory_space<vmem>>, %arg2: memref<256x256xbf16, #tpu.memory_space<vmem>>, %arg3: memref<1x256xf32, #tpu.memory_space<vmem>>, %arg4: memref<1x256xf32, #tpu.memory_space<vmem>>, %arg5: memref<8x1x256xf32, #tpu.memory_space<vmem>>) attributes {dimension_semantics = [#tpu.dimension_semantics<parallel>], iteration_bounds = array<i64: 1>, scalar_prefetch = 0 : i64, scratch_operands = 0 : i64, tpu.core_type = #tpu.core_type<tc>, window_params = [{transform_indices = @transform_0, window_bounds = array<i64: 8, 8, 256>}, {pipeline_mode = #tpu.pipeline_mode<synchronous>, transform_indices = @transform_1, window_bounds = array<i64: 256, 256>}, {pipeline_mode = #tpu.pipeline_mode<synchronous>, transform_indices = @transform_2, window_bounds = array<i64: 1, 256>}, {pipeline_mode = #tpu.pipeline_mode<synchronous>, transform_indices = @transform_3, window_bounds = array<i64: 1, 256>}, {transform_indices = @transform_4, window_bounds = array<i64: 8, 1, 256>}]} {
    %c0 = arith.constant 0 : index
    %c0_0 = arith.constant 0 : index
    %c0_1 = arith.constant 0 : index
    %0 = vector.load %arg1[%c0, %c0_0, %c0_1] : memref<8x8x256xf32, #tpu.memory_space<vmem>>, vector<8x8x256xf32>
    %1 = vector.shape_cast %0 : vector<8x8x256xf32> to vector<64x256xf32>
    %2 = arith.truncf %1 : vector<64x256xf32> to vector<64x256xbf16>
    %c0_2 = arith.constant 0 : index
    %c0_3 = arith.constant 0 : index
    %3 = vector.load %arg2[%c0_2, %c0_3] : memref<256x256xbf16, #tpu.memory_space<vmem>>, vector<256x256xbf16>
    %cst = arith.constant dense<0.000000e+00> : vector<64x256xf32>
    %4 = tpu.matmul %2, %3, %cst {dimension_numbers = #tpu.dot_dimension_numbers<[1], [0], [0], [1], [0, 0, 1, 1], [], []>} : vector<64x256xbf16>, vector<256x256xbf16>, vector<64x256xf32> -> vector<64x256xf32>
    %c0_4 = arith.constant 0 : index
    %c0_5 = arith.constant 0 : index
    %5 = vector.load %arg3[%c0_4, %c0_5] : memref<1x256xf32, #tpu.memory_space<vmem>>, vector<1x256xf32>
    %6 = vector.broadcast %5 : vector<1x256xf32> to vector<64x256xf32>
    %7 = arith.addf %4, %6 : vector<64x256xf32>
    %8 = math.tanh %7 : vector<64x256xf32>
    %9 = vector.shape_cast %8 : vector<64x256xf32> to vector<8x8x256xf32>
    %c0_6 = arith.constant 0 : index
    %c0_7 = arith.constant 0 : index
    %10 = vector.load %arg4[%c0_6, %c0_7] : memref<1x256xf32, #tpu.memory_space<vmem>>, vector<1x256xf32>
    %11 = vector.shape_cast %10 : vector<1x256xf32> to vector<1x1x256xf32>
    %12 = vector.broadcast %11 : vector<1x1x256xf32> to vector<8x8x256xf32>
    %13 = arith.mulf %9, %12 : vector<8x8x256xf32>
    %cst_8 = arith.constant dense<0.000000e+00> : vector<8x8xf32>
    %14 = vector.multi_reduction <add>, %13, %cst_8 [2] : vector<8x8x256xf32> to vector<8x8xf32>
    %15 = vector.shape_cast %14 : vector<8x8xf32> to vector<8x8x1xf32>
    %cst_9 = arith.constant dense<0xFF800000> : vector<8x1xf32>
    %16 = vector.multi_reduction <maximumf>, %15, %cst_9 [1] : vector<8x8x1xf32> to vector<8x1xf32>
    %17 = vector.shape_cast %16 : vector<8x1xf32> to vector<8x1x1xf32>
    %18 = vector.broadcast %17 : vector<8x1x1xf32> to vector<8x8x1xf32>
    %19 = arith.subf %15, %18 : vector<8x8x1xf32>
    %20 = math.exp %19 : vector<8x8x1xf32>
    %cst_10 = arith.constant dense<0.000000e+00> : vector<8x1xf32>
    %21 = vector.multi_reduction <add>, %20, %cst_10 [1] : vector<8x8x1xf32> to vector<8x1xf32>
    %22 = vector.shape_cast %21 : vector<8x1xf32> to vector<8x1x1xf32>
    %23 = tpu.reciprocal %22 {approx = true} : vector<8x1x1xf32> -> vector<8x1x1xf32>
    %24 = vector.broadcast %23 : vector<8x1x1xf32> to vector<8x8x1xf32>
    %25 = arith.mulf %20, %24 : vector<8x8x1xf32>
    %26 = vector.broadcast %25 : vector<8x8x1xf32> to vector<8x8x256xf32>
    %27 = arith.mulf %0, %26 : vector<8x8x256xf32>
    %cst_11 = arith.constant dense<0.000000e+00> : vector<8x256xf32>
    %28 = vector.multi_reduction <add>, %27, %cst_11 [1] : vector<8x8x256xf32> to vector<8x256xf32>
    %29 = vector.shape_cast %28 : vector<8x256xf32> to vector<8x1x256xf32>
    %c0_12 = arith.constant 0 : index
    %c0_13 = arith.constant 0 : index
    %c0_14 = arith.constant 0 : index
    %30 = vector.load %arg5[%c0_12, %c0_13, %c0_14] : memref<8x1x256xf32, #tpu.memory_space<vmem>>, vector<8x1x256xf32>
    tpu.vector_store %arg5[%c0_12, %c0_13, %c0_14], %29 {strides = array<i32>} : memref<8x1x256xf32, #tpu.memory_space<vmem>>, vector<8x1x256xf32>,
    return
  }
  func.func @transform_0(%arg0: i32) -> (i32, i32, i32) {
    %c0_i32 = arith.constant 0 : i32
    %c0_i32_0 = arith.constant 0 : i32
    %c0_i32_1 = arith.constant 0 : i32
    return %arg0, %c0_i32, %c0_i32_0 : i32, i32, i32
  }
  func.func @transform_1(%arg0: i32) -> (i32, i32) {
    %c0_i32 = arith.constant 0 : i32
    %c0_i32_0 = arith.constant 0 : i32
    %c0_i32_1 = arith.constant 0 : i32
    return %c0_i32, %c0_i32_0 : i32, i32
  }
  func.func @transform_2(%arg0: i32) -> (i32, i32) {
    %c0_i32 = arith.constant 0 : i32
    %c0_i32_0 = arith.constant 0 : i32
    %c0_i32_1 = arith.constant 0 : i32
    return %c0_i32, %c0_i32_0 : i32, i32
  }
  func.func @transform_3(%arg0: i32) -> (i32, i32) {
    %c0_i32 = arith.constant 0 : i32
    %c0_i32_0 = arith.constant 0 : i32
    %c0_i32_1 = arith.constant 0 : i32
    return %c0_i32, %c0_i32_0 : i32, i32
  }
  func.func @transform_4(%arg0: i32) -> (i32, i32, i32) {
    %c0_i32 = arith.constant 0 : i32
    %c0_i32_0 = arith.constant 0 : i32
    %c0_i32_1 = arith.constant 0 : i32
    return %arg0, %c0_i32, %c0_i32_0 : i32, i32, i32
  }
}

</mosaic_0001>

<bundles_post_ra>
// kernel: tpu_custom_call.1
= control target key start
LH: loop header
LB: loop body
LE: loop exit
PB: predicated region body
PF: predicated region fallthrough
CT: control target
= control target key end

     0   :  { %9 = vsyncpa [#allocation3], 0  ;;  %s1330_s0 = inlined_call_operand.hbm [shape: f32[8,8,256], index: 0, kind: input, shape index: {}]   ;;  %s1331_s1 = inlined_call_operand.hbm [shape: bf16[256,256], index: 1, kind: input, shape index: {}]   ;;  %s1332_s2 = inlined_call_operand.vmem [shape: f32[1,256], index: 2, kind: input, shape index: {}]   ;;  %s1333_s3 = inlined_call_operand.vmem [shape: f32[1,256], index: 3, kind: input, shape index: {}]   ;;  %s1334_s4 = inlined_call_operand.hbm [shape: f32[8,1,256], index: 4, kind: output, shape index: {}]  }
   0x1   :  { %10 = vsyncpa [#allocation6], 0 }
   0x2   :  { %11 = vsyncpa [#allocation4], 0  ;;  %s1095_s15 = smov [#allocation2]   ;;  %s1023_s19 = scalar_lea.hbm %s1330_s0, 2048 }
   0x3   :  { %s17_s16 = sshll.u32 %s1095_s15, 4  ;;  %p1024_p0 = scmp.ne.s32.totalorder %s1330_s0, %s1023_s19  ;;  %s18_s16 = int_to_ptr.vmem [resolvable:$true] %s17_s16 }
   0x4   :  { %p1027_p1 = scmp.lt.u32.totalorder %s1023_s19, %s1330_s0 }
   0x6   :  { %p1029_p2 = pnand %p1027_p1, %p1024_p0 }
   0x8   :  { %1032 = shalt.err (!%p1029_p2)
}
   0x9   :  { %s1033_s24 = scalar_lea.vmem %s18_s16, 2048  ;;  %p1038_p4 = scmp.lt.s32.totalorder %s18_s16, %s18_s16 }
   0xa   :  { %p1034_p3 = scmp.ne.s32.totalorder %s18_s16, %s1033_s24  ;;  %p1039_p5 = scmp.lt.s32.totalorder %s1033_s24, %s1033_s24 }
   0xc   :  { %p1040_p6 = por %p1039_p5, %p1038_p4 }
   0xe   :  { %p1041_p7 = pnand %p1040_p6, %p1034_p3 }
  0x10   :  { %1044 = shalt.err (!%p1041_p7)
}
  0x11   :  { %s1096_s25 = smov 256   ;;  %s1097_s26 = smov 16  }
  0x12   :  { %23 = dma.hbm_to_vmem [thread:$0]  %s1330_s0, 2048, %s18_s16, [#allocation3], %s1096_s25, %s1096_s25, %s1097_s26  }
  0x13   :  { %s1098_s29 = smov [#allocation5]   ;;  %s1045_s7 = scalar_lea.hbm %s1331_s1, 4096 }
  0x14   :  { %s29_s30 = sshll.u32 %s1098_s29, 4  ;;  %p1046_p8 = scmp.ne.s32.totalorder %s1331_s1, %s1045_s7  ;;  %s30_s30 = int_to_ptr.vmem [resolvable:$true] %s29_s30 }
  0x15   :  { %p1049_p9 = scmp.lt.u32.totalorder %s1045_s7, %s1331_s1 }
  0x17   :  { %p1051_p10 = pnand %p1049_p9, %p1046_p8 }
  0x19   :  { %1054 = shalt.err (!%p1051_p10)
}
  0x1a   :  { %s1055_s12 = scalar_lea.vmem %s30_s30, 4096  ;;  %p1060_p12 = scmp.lt.s32.totalorder %s30_s30, %s30_s30 }
  0x1b   :  { %p1056_p11 = scmp.ne.s32.totalorder %s30_s30, %s1055_s12  ;;  %p1061_p13 = scmp.lt.s32.totalorder %s1055_s12, %s1055_s12 }
  0x1d   :  { %p1062_p0 = por %p1061_p13, %p1060_p12 }
  0x1f   :  { %p1063_p1 = pnand %p1062_p0, %p1056_p11 }
  0x21   :  { %1066 = shalt.err (!%p1063_p1)
}
  0x22   :  { %s1099_s0 = smov 128   ;;  %s1100_s13 = smov 8  }
  0x23   :  { %35 = dma.hbm_to_vmem [thread:$0]  %s1331_s1, 4096, %s30_s30, [#allocation6], %s1099_s0, %s1099_s0, %s1100_s13  }
  0x24   :  { %1089 = dma.done.wait [#allocation3], 2048  }
  0x25   :  { %1090 = vsyncadd [#allocation3], 4294965248 }
  0x26   :  { %1091 = dma.done.wait [#allocation6], 4096  }
  0x27   :  { %1092 = vsyncadd [#allocation6], 4294963200  ;;  %v911_v0 = vld [vmem:[#allocation5 + $0x4] ss:$8 sps:$4 sm:$0xff]   ;;  %v913_v1 = vld [vmem:[#allocation5] ss:$8 sps:$4 sm:$0xff]   ;;  %v104_v56 = vlaneseq }
  0x28   :  { %274 = vmatprep.subr.bf16.mxu0 %v911_v0  ;;  %869 = vmatprep.subr.bf16.mxu1 %v911_v0  ;;  %v914_v2 = vld [vmem:[#allocation5 + $0x14] ss:$8 sps:$4 sm:$0xff]   ;;  %v916_v3 = vld [vmem:[#allocation5 + $0x10] ss:$8 sps:$4 sm:$0xff]   ;;  %v917_v4 = vld [vmem:[#allocation5 + $0x24] ss:$8 sps:$4 sm:$0xff]  }
  0x29   :  { %275 = vmatpush1.bf16.msra.mxu0 %v913_v1  ;;  %885 = vmatpush1.bf16.msra.mxu1 %v913_v1  ;;  %v919_v5 = vld [vmem:[#allocation5 + $0x20] ss:$8 sps:$4 sm:$0xff]   ;;  %v920_v6 = vld [vmem:[#allocation5 + $0x34] ss:$8 sps:$4 sm:$0xff]   ;;  %v922_v7 = vld [vmem:[#allocation5 + $0x30] ss:$8 sps:$4 sm:$0xff]  }
  0x2a   :  { %276 = vmatprep.subr.bf16.mxu0 %v914_v2  ;;  %870 = vmatprep.subr.bf16.mxu1 %v914_v2  ;;  %v923_v8 = vld [vmem:[#allocation5 + $0x44] ss:$8 sps:$4 sm:$0xff]   ;;  %v925_v9 = vld [vmem:[#allocation5 + $0x40] ss:$8 sps:$4 sm:$0xff]   ;;  %v926_v10 = vld [vmem:[#allocation5 + $0x54] ss:$8 sps:$4 sm:$0xff]  }
  0x2b   :  { %v928_v11 = vld [vmem:[#allocation5 + $0x50] ss:$8 sps:$4 sm:$0xff]   ;;  %v929_v12 = vld [vmem:[#allocation5 + $0x64] ss:$8 sps:$4 sm:$0xff]   ;;  %v931_v18 = vld [vmem:[#allocation5 + $0x60] ss:$8 sps:$4 sm:$0xff]  }
  0x2c   :  { %v1154_v13 = vld [vmem:[#allocation2 + $0x8] sm:$0xff]  ;;  %v1156_v14 = vld [vmem:[#allocation2 + $0x18] sm:$0xff]  ;;  %v1166_v38 = vld [vmem:[#allocation2] sm:$0xff]  ;;  %v1203_v57 = vshrl.u32 %v104_v56, 7  ;;  %vm1273_vm0 = vcmp.lt.s32.totalorder %v104_v56, 256 }
  0x2d   :  { %277 = vmatpush1.bf16.msra.mxu0 %v916_v3  ;;  %886 = vmatpush1.bf16.msra.mxu1 %v916_v3  ;;  %v63_v15 = vpack.c.bf16 %v1156_v14, %v1154_v13  ;;  %v1160_v16 = vld [vmem:[#allocation2 + $0x48] sm:$0xff]  ;;  %v1162_v17 = vld [vmem:[#allocation2 + $0x58] sm:$0xff]  ;;  %v1168_v39 = vld [vmem:[#allocation2 + $0x10] sm:$0xff] }
  0x2e   :  { %278 = vmatprep.subr.bf16.mxu0 %v917_v4  ;;  %871 = vmatprep.subr.bf16.mxu1 %v917_v4  ;;  %v67_v19 = vpack.c.bf16 %v1162_v17, %v1160_v16  ;;  %v932_v20 = vld [vmem:[#allocation5 + $0x74] ss:$8 sps:$4 sm:$0xff]   ;;  %v934_v21 = vld [vmem:[#allocation5 + $0x70] ss:$8 sps:$4 sm:$0xff]   ;;  %v935_v22 = vld [vmem:[#allocation5 + $0x84] ss:$8 sps:$4 sm:$0xff]   ;;  %v62_v46 = vpack.c.bf16 %v1168_v39, %v1166_v38 }
  0x2f   :  { %306 = vmatprep.mubr.bf16.mxu0 %v63_v15  ;;  %v937_v23 = vld [vmem:[#allocation5 + $0x80] ss:$8 sps:$4 sm:$0xff]   ;;  %v938_v24 = vld [vmem:[#allocation5 + $0x94] ss:$8 sps:$4 sm:$0xff]   ;;  %v940_v25 = vld [vmem:[#allocation5 + $0x90] ss:$8 sps:$4 sm:$0xff]  }
  0x30   :  { %326 = vmatprep.mubr.bf16.mxu1 %v67_v19  ;;  %v941_v26 = vld [vmem:[#allocation5 + $0xa4] ss:$8 sps:$4 sm:$0xff]   ;;  %v943_v27 = vld [vmem:[#allocation5 + $0xa0] ss:$8 sps:$4 sm:$0xff]   ;;  %v944_v28 = vld [vmem:[#allocation5 + $0xb4] ss:$8 sps:$4 sm:$0xff]  }
  0x31   :  { %279 = vmatpush1.bf16.msra.mxu0 %v919_v5  ;;  %887 = vmatpush1.bf16.msra.mxu1 %v919_v5  ;;  %v946_v29 = vld [vmem:[#allocation5 + $0xb0] ss:$8 sps:$4 sm:$0xff]   ;;  %v947_v30 = vld [vmem:[#allocation5 + $0xc4] ss:$8 sps:$4 sm:$0xff]   ;;  %v949_v31 = vld [vmem:[#allocation5 + $0xc0] ss:$8 sps:$4 sm:$0xff]  }
  0x32   :  { %280 = vmatprep.subr.bf16.mxu0 %v920_v6  ;;  %872 = vmatprep.subr.bf16.mxu1 %v920_v6  ;;  %v950_v32 = vld [vmem:[#allocation5 + $0xd4] ss:$8 sps:$4 sm:$0xff]   ;;  %v952_v33 = vld [vmem:[#allocation5 + $0xd0] ss:$8 sps:$4 sm:$0xff]   ;;  %v953_v34 = vld [vmem:[#allocation5 + $0xe4] ss:$8 sps:$4 sm:$0xff]  }
  0x33   :  { %v955_v35 = vld [vmem:[#allocation5 + $0xe0] ss:$8 sps:$4 sm:$0xff]   ;;  %v956_v36 = vld [vmem:[#allocation5 + $0xf4] ss:$8 sps:$4 sm:$0xff]   ;;  %v958_v37 = vld [vmem:[#allocation5 + $0xf0] ss:$8 sps:$4 sm:$0xff]  }
  0x34   :  { %v1170_v40 = vld [vmem:[#allocation2 + $0x40] sm:$0xff]  ;;  %v1172_v41 = vld [vmem:[#allocation2 + $0x50] sm:$0xff]  ;;  %v1174_v42 = vld [vmem:[#allocation2 + $0x28] sm:$0xff]  ;;  %v106_v58 = vsub.s32 0, %v1203_v57  ;;  %v110_v60 = vsub.s32 1, %v1203_v57 }
  0x35   :  { %281 = vmatpush1.bf16.msra.mxu0 %v922_v7  ;;  %888 = vmatpush1.bf16.msra.mxu1 %v922_v7  ;;  %v1176_v43 = vld [vmem:[#allocation2 + $0x38] sm:$0xff]  ;;  %v1178_v44 = vld [vmem:[#allocation2 + $0x68] sm:$0xff]  ;;  %v66_v47 = vpack.c.bf16 %v1172_v41, %v1170_v40  ;;  %v1190_v50 = vld [vmem:[#allocation2 + $0x20] sm:$0xff] }
  0x36   :  { %282 = vmatprep.subr.bf16.mxu0 %v923_v8  ;;  %873 = vmatprep.subr.bf16.mxu1 %v923_v8  ;;  %v1180_v45 = vld [vmem:[#allocation2 + $0x78] sm:$0xff]  ;;  %v65_v48 = vpack.c.bf16 %v1176_v43, %v1174_v42  ;;  %v1192_v51 = vld [vmem:[#allocation2 + $0x30] sm:$0xff]  ;;  %v1194_v52 = vld [vmem:[#allocation2 + $0x60] sm:$0xff] }
  0x37   :  { %v69_v49 = vpack.c.bf16 %v1180_v45, %v1178_v44  ;;  %v1196_v53 = vld [vmem:[#allocation2 + $0x70] sm:$0xff]  ;;  %v64_v54 = vpack.c.bf16 %v1192_v51, %v1190_v50  ;;  %v102_v59 = vld [vmem:[%s1332_s2] sm:$0x3] }
  0x38   :  { %v68_v55 = vpack.c.bf16 %v1196_v53, %v1194_v52  ;;  %v107_v61 = vrot.slane %v102_v59, %v106_v58  ;;  %v111_v62 = vrot.slane %v102_v59, %v110_v60  ;;  %v363_v19 = vld [vmem:[%s1333_s3] sm:$0x3]  ;;  %s1102_s3 = smov [#allocation7]  }
  0x39   :  { %283 = vmatpush1.bf16.msra.mxu0 %v925_v9  ;;  %889 = vmatpush1.bf16.msra.mxu1 %v925_v9  ;;  %s824_s18 = sshll.u32 %s1102_s3, 4  ;;  %s825_s18 = int_to_ptr.vmem [resolvable:$true] %s824_s18 }
  0x3a   :  { %284 = vmatprep.subr.bf16.mxu0 %v926_v10  ;;  %874 = vmatprep.subr.bf16.mxu1 %v926_v10  ;;  %s1067_s19 = scalar_lea.vmem %s825_s18, 256  ;;  %p1072_p3 = scmp.lt.s32.totalorder %s825_s18, %s825_s18 }
  0x3b   :  { %p1068_p2 = scmp.ne.s32.totalorder %s825_s18, %s1067_s19  ;;  %p1073_p4 = scmp.lt.s32.totalorder %s1067_s19, %s1067_s19 }
  0x3d   :  { %285 = vmatpush1.bf16.msra.mxu0 %v928_v11  ;;  %890 = vmatpush1.bf16.msra.mxu1 %v928_v11  ;;  %p1074_p5 = por %p1073_p4, %p1072_p3 }
  0x3e   :  { %286 = vmatprep.subr.bf16.mxu0 %v929_v12  ;;  %875 = vmatprep.subr.bf16.mxu1 %v929_v12 }
  0x3f   :  { %p1075_p6 = pnand %p1074_p5, %p1068_p2 }
  0x41   :  { %287 = vmatpush1.bf16.msra.mxu0 %v931_v18  ;;  %891 = vmatpush1.bf16.msra.mxu1 %v931_v18 }
  0x42   :  { %288 = vmatprep.subr.bf16.mxu0 %v932_v20  ;;  %876 = vmatprep.subr.bf16.mxu1 %v932_v20 }
  0x45   :  { %289 = vmatpush1.bf16.msra.mxu0 %v934_v21  ;;  %892 = vmatpush1.bf16.msra.mxu1 %v934_v21 }
  0x46   :  { %290 = vmatprep.subr.bf16.mxu0 %v935_v22  ;;  %877 = vmatprep.subr.bf16.mxu1 %v935_v22 }
  0x49   :  { %291 = vmatpush1.bf16.msra.mxu0 %v937_v23  ;;  %893 = vmatpush1.bf16.msra.mxu1 %v937_v23 }
  0x4a   :  { %292 = vmatprep.subr.bf16.mxu0 %v938_v24  ;;  %878 = vmatprep.subr.bf16.mxu1 %v938_v24 }
  0x4d   :  { %293 = vmatpush1.bf16.msra.mxu0 %v940_v25  ;;  %894 = vmatpush1.bf16.msra.mxu1 %v940_v25 }
  0x4e   :  { %294 = vmatprep.subr.bf16.mxu0 %v941_v26  ;;  %879 = vmatprep.subr.bf16.mxu1 %v941_v26 }
  0x51   :  { %295 = vmatpush1.bf16.msra.mxu0 %v943_v27  ;;  %895 = vmatpush1.bf16.msra.mxu1 %v943_v27 }
  0x52   :  { %296 = vmatprep.subr.bf16.mxu0 %v944_v28  ;;  %880 = vmatprep.subr.bf16.mxu1 %v944_v28  ;;  %v368_v28 = vrot.slane %v363_v19, %v106_v58 }
  0x55   :  { %297 = vmatpush1.bf16.msra.mxu0 %v946_v29  ;;  %896 = vmatpush1.bf16.msra.mxu1 %v946_v29 }
  0x56   :  { %298 = vmatprep.subr.bf16.mxu0 %v947_v30  ;;  %881 = vmatprep.subr.bf16.mxu1 %v947_v30 }
  0x59   :  { %299 = vmatpush1.bf16.msra.mxu0 %v949_v31  ;;  %897 = vmatpush1.bf16.msra.mxu1 %v949_v31 }
  0x5a   :  { %300 = vmatprep.subr.bf16.mxu0 %v950_v32  ;;  %882 = vmatprep.subr.bf16.mxu1 %v950_v32 }
  0x5d   :  { %301 = vmatpush1.bf16.msra.mxu0 %v952_v33  ;;  %898 = vmatpush1.bf16.msra.mxu1 %v952_v33 }
  0x5e   :  { %302 = vmatprep.subr.bf16.mxu0 %v953_v34  ;;  %883 = vmatprep.subr.bf16.mxu1 %v953_v34 }
  0x61   :  { %303 = vmatpush1.bf16.msra.mxu0 %v955_v35  ;;  %899 = vmatpush1.bf16.msra.mxu1 %v955_v35  ;;  %v372_v35 = vrot.slane %v363_v19, %v110_v60 }
  0x62   :  { %304 = vmatprep.subr.bf16.mxu0 %v956_v36  ;;  %884 = vmatprep.subr.bf16.mxu1 %v956_v36 }
  0x65   :  { %305 = vmatpush1.bf16.msra.mxu0 %v958_v37  ;;  %900 = vmatpush1.bf16.msra.mxu1 %v958_v37 }
  0x68   :  { %307 = vmatmul.mubr.bf16.vlgmr.msra.gmra.mrb[0].mxu0 %v62_v46  ;;  %327 = vmatmul.mubr.bf16.vlgmr.msra.gmra.mrb[0].mxu1 %v66_v47 }
  0x69   :  { %316 = vmatprep.mubr.bf16.mxu0 %v65_v48  ;;  %336 = vmatprep.mubr.bf16.mxu1 %v69_v49 }
  0x70   :  { %317 = vmatmul.mubr.bf16.gmra.mrb[4].mxu0 %v64_v54  ;;  %337 = vmatmul.mubr.bf16.gmra.mrb[4].mxu1 %v68_v55 }
 0x13b   :  { %v308_v63 = vpop.f32.mrb[0].mxu0  ;;  %v328_v0 = vpop.f32.mrb[0].mxu1 }
 0x13c   :  { %v309_v1 = vadd.f32 %v308_v63, %v107_v61  ;;  %v329_v2 = vadd.f32 %v328_v0, %v107_v61  ;;  %v310_v3 = vpop.f32.mrb[1].mxu0  ;;  %v330_v4 = vpop.f32.mrb[1].mxu1 }
 0x13d   :  { %v311_v5 = vadd.f32 %v310_v3, %v111_v62  ;;  %v331_v6 = vadd.f32 %v330_v4, %v111_v62  ;;  %v312_v7 = vpop.f32.mrb[2].mxu0  ;;  %v332_v8 = vpop.f32.mrb[2].mxu1 }
 0x13e   :  { %959 = vtanh.f32 %v309_v1  ;;  %v313_v9 = vadd.f32 %v312_v7, %v107_v61  ;;  %v314_v10 = vpop.f32.mrb[3].mxu0  ;;  %v334_v11 = vpop.f32.mrb[3].mxu1  ;;  %v333_v12 = vadd.f32 %v332_v8, %v107_v61 }
 0x13f   :  { %961 = vtanh.f32 %v329_v2  ;;  %v315_v15 = vadd.f32 %v314_v10, %v111_v62  ;;  %v335_v18 = vadd.f32 %v334_v11, %v111_v62 }
 0x140   :  { %963 = vtanh.f32 %v311_v5 }
 0x141   :  { %965 = vtanh.f32 %v331_v6 }
 0x142   :  { %967 = vtanh.f32 %v313_v9 }
 0x143   :  { %969 = vtanh.f32 %v333_v12  ;;  %v318_v20 = vpop.f32.mrb[4].mxu0  ;;  %v338_v21 = vpop.f32.mrb[4].mxu1 }
 0x144   :  { %971 = vtanh.f32 %v315_v15  ;;  %v319_v22 = vadd.f32 %v318_v20, %v107_v61  ;;  %v320_v23 = vpop.f32.mrb[5].mxu0  ;;  %v340_v24 = vpop.f32.mrb[5].mxu1  ;;  %v339_v31 = vadd.f32 %v338_v21, %v107_v61 }
 0x145   :  { %973 = vtanh.f32 %v335_v18  ;;  %v321_v25 = vadd.f32 %v320_v23, %v111_v62  ;;  %v322_v26 = vpop.f32.mrb[6].mxu0  ;;  %v342_v27 = vpop.f32.mrb[6].mxu1  ;;  %v341_v34 = vadd.f32 %v340_v24, %v111_v62 }
 0x146   :  { %975 = vtanh.f32 %v319_v22  ;;  %v323_v29 = vadd.f32 %v322_v26, %v107_v61  ;;  %v324_v30 = vpop.f32.mrb[7].mxu0  ;;  %v344_v32 = vpop.f32.mrb[7].mxu1  ;;  %v343_v37 = vadd.f32 %v342_v27, %v107_v61 }
 0x147   :  { %977 = vtanh.f32 %v321_v25  ;;  %v325_v33 = vadd.f32 %v324_v30, %v111_v62  ;;  %v345_v47 = vadd.f32 %v344_v32, %v111_v62 }
 0x148   :  { %v960_v36 = vpop.eup %959  ;;  %979 = vtanh.f32 %v323_v29 }
 0x149   :  { %v962_v46 = vpop.eup %961  ;;  %981 = vtanh.f32 %v325_v33  ;;  %v375_v48 = vmul.f32 %v960_v36, %v368_v28 }
 0x14a   :  { %v964_v49 = vpop.eup %963  ;;  %983 = vtanh.f32 %v339_v31  ;;  %v383_v54 = vmul.f32 %v962_v46, %v368_v28 }
 0x14b   :  { %v966_v55 = vpop.eup %965  ;;  %985 = vtanh.f32 %v341_v34  ;;  %v376_v58 = vmul.f32 %v964_v49, %v372_v35 }
 0x14c   :  { %v968_v59 = vpop.eup %967  ;;  %987 = vtanh.f32 %v343_v37  ;;  %v384_v63 = vmul.f32 %v966_v55, %v372_v35 }
 0x14d   :  { %v970_v0 = vpop.eup %969  ;;  %989 = vtanh.f32 %v345_v47  ;;  %v391_v1 = vadd.f32 %v376_v58, %v375_v48  ;;  %v377_v60 = vmul.f32 %v968_v59, %v368_v28 }
 0x14e   :  { %v972_v2 = vpop.eup %971  ;;  %v385_v3 = vmul.f32 %v970_v0, %v368_v28  ;;  %v403_v61 = vadd.f32 %v384_v63, %v383_v54 }
 0x14f   :  { %v974_v4 = vpop.eup %973  ;;  %392 = vadd.xlane.f32.xlu0 %v391_v1  ;;  %v378_v62 = vmul.f32 %v972_v2, %v372_v35 }
 0x150   :  { %v976_v5 = vpop.eup %975  ;;  %v386_v6 = vmul.f32 %v974_v4, %v372_v35 }
 0x151   :  { %v978_v7 = vpop.eup %977  ;;  %v379_v8 = vmul.f32 %v976_v5, %v368_v28  ;;  %v394_v9 = vadd.f32 %v378_v62, %v377_v60 }
 0x152   :  { %v980_v10 = vpop.eup %979  ;;  %v406_v11 = vadd.f32 %v386_v6, %v385_v3  ;;  %v380_v12 = vmul.f32 %v978_v7, %v372_v35 }
 0x153   :  { %v982_v15 = vpop.eup %981  ;;  %404 = vadd.xlane.f32.xlu0 %v403_v61  ;;  %v381_v18 = vmul.f32 %v980_v10, %v368_v28 }
 0x154   :  { %v984_v19 = vpop.eup %983  ;;  %407 = vadd.xlane.f32.xlu1 %v406_v11  ;;  %v397_v20 = vadd.f32 %v380_v12, %v379_v8  ;;  %v382_v21 = vmul.f32 %v982_v15, %v372_v35 }
 0x155   :  { %v986_v22 = vpop.eup %985  ;;  %v387_v23 = vmul.f32 %v984_v19, %v368_v28 }
 0x156   :  { %v988_v24 = vpop.eup %987  ;;  %v400_v25 = vadd.f32 %v382_v21, %v381_v18  ;;  %v388_v26 = vmul.f32 %v986_v22, %v372_v35 }
 0x157   :  { %v990_v27 = vpop.eup %989  ;;  %395 = vadd.xlane.f32.xlu0 %v394_v9  ;;  %v389_v29 = vmul.f32 %v988_v24, %v368_v28 }
 0x158   :  { %398 = vadd.xlane.f32.xlu1 %v397_v20  ;;  %v409_v30 = vadd.f32 %v388_v26, %v387_v23  ;;  %v390_v31 = vmul.f32 %v990_v27, %v372_v35 }
 0x15a   :  { %v412_v32 = vadd.f32 %v390_v31, %v389_v29 }
 0x15b   :  { %410 = vadd.xlane.f32.xlu0 %v409_v30 }
 0x15c   :  { %401 = vadd.xlane.f32.xlu1 %v400_v25 }
 0x160   :  { %413 = vadd.xlane.f32.xlu1 %v412_v32 }
 0x1dc   :  { %v393_v33 = vpop.xlane.xlu0 %392 }
 0x1dd   :  { %v415_v34 = vrot.slane %v393_v33, 4 }
 0x1df   :  { %v416_v36 = vmax.f32 %v393_v33, %v415_v34 }
 0x1e0   :  { %v405_v37 = vpop.xlane.xlu0 %404 }
 0x1e1   :  { %v417_v46 = vrot.slane %v416_v36, 2  ;;  %v408_v47 = vpop.xlane.xlu1 %407  ;;  %v439_v48 = vrot.slane %v405_v37, 4 }
 0x1e2   :  { %v445_v49 = vrot.slane %v408_v47, 4 }
 0x1e3   :  { %v418_v54 = vmax.f32 %v416_v36, %v417_v46  ;;  %v440_v55 = vmax.f32 %v405_v37, %v439_v48 }
 0x1e4   :  { %v446_v58 = vmax.f32 %v408_v47, %v445_v49  ;;  %v396_v59 = vpop.xlane.xlu0 %395 }
 0x1e5   :  { %v419_v28 = vrot.slane %v418_v54, 1  ;;  %v441_v63 = vrot.slane %v440_v55, 2  ;;  %v399_v0 = vpop.xlane.xlu1 %398  ;;  %v421_v35 = vrot.slane %v396_v59, 4 }
 0x1e6   :  { %v447_v1 = vrot.slane %v446_v58, 2  ;;  %v427_v60 = vrot.slane %v399_v0, 4 }
 0x1e7   :  { %v420_v2 = vmax.f32 %v418_v54, %v419_v28  ;;  %v442_v3 = vmax.f32 %v440_v55, %v441_v63  ;;  %v422_v61 = vmax.f32 %v396_v59, %v421_v35 }
 0x1e8   :  { %v448_v4 = vmax.f32 %v446_v58, %v447_v1  ;;  %v428_v62 = vmax.f32 %v399_v0, %v427_v60  ;;  %v411_v5 = vpop.xlane.xlu0 %410 }
 0x1e9   :  { %v463_v6 = vsub.f32 %v393_v33, %v420_v2  ;;  %v443_v7 = vrot.slane %v442_v3, 1  ;;  %v423_v8 = vrot.slane %v422_v61, 2  ;;  %v402_v9 = vpop.xlane.xlu1 %401  ;;  %v451_v10 = vrot.slane %v411_v5, 4 }
 0x1ea   :  { %v449_v11 = vrot.slane %v448_v4, 1  ;;  %v429_v12 = vrot.slane %v428_v62, 2  ;;  %v433_v15 = vrot.slane %v402_v9, 4 }
 0x1eb   :  { %v471_v18 = vmul.f32 1.442695, %v463_v6  ;;  %v444_v19 = vmax.f32 %v442_v3, %v443_v7  ;;  %v424_v20 = vmax.f32 %v422_v61, %v423_v8  ;;  %v452_v21 = vmax.f32 %v411_v5, %v451_v10 }
 0x1ec   :  { %v450_v22 = vmax.f32 %v448_v4, %v449_v11  ;;  %v430_v23 = vmax.f32 %v428_v62, %v429_v12  ;;  %v434_v24 = vmax.f32 %v402_v9, %v433_v15 }
 0x1ed   :  { %991 = vpow2.f32 %v471_v18  ;;  %v467_v25 = vsub.f32 %v405_v37, %v444_v19  ;;  %v425_v26 = vrot.slane %v424_v20, 1  ;;  %v453_v27 = vrot.slane %v452_v21, 2  ;;  %v414_v29 = vpop.xlane.xlu1 %413 }
 0x1ee   :  { %v468_v30 = vsub.f32 %v408_v47, %v450_v22  ;;  %v431_v31 = vrot.slane %v430_v23, 1  ;;  %v435_v32 = vrot.slane %v434_v24, 2  ;;  %v457_v33 = vrot.slane %v414_v29, 4 }
 0x1ef   :  { %v479_v34 = vmul.f32 1.442695, %v467_v25  ;;  %v426_v36 = vmax.f32 %v424_v20, %v425_v26  ;;  %v454_v46 = vmax.f32 %v452_v21, %v453_v27 }
 0x1f0   :  { %v481_v48 = vmul.f32 1.442695, %v468_v30  ;;  %v432_v49 = vmax.f32 %v430_v23, %v431_v31  ;;  %v436_v54 = vmax.f32 %v434_v24, %v435_v32  ;;  %v458_v55 = vmax.f32 %v414_v29, %v457_v33 }
 0x1f1   :  { %993 = vpow2.f32 %v479_v34  ;;  %v464_v58 = vsub.f32 %v396_v59, %v426_v36  ;;  %v455_v28 = vrot.slane %v454_v46, 1 }
 0x1f2   :  { %995 = vpow2.f32 %v481_v48  ;;  %v465_v63 = vsub.f32 %v399_v0, %v432_v49  ;;  %v437_v37 = vrot.slane %v436_v54, 1  ;;  %v459_v35 = vrot.slane %v458_v55, 2 }
 0x1f3   :  { %v473_v1 = vmul.f32 1.442695, %v464_v58  ;;  %v456_v60 = vmax.f32 %v454_v46, %v455_v28 }
 0x1f4   :  { %v475_v47 = vmul.f32 1.442695, %v465_v63  ;;  %v438_v2 = vmax.f32 %v436_v54, %v437_v37  ;;  %v460_v3 = vmax.f32 %v458_v55, %v459_v35 }
 0x1f5   :  { %997 = vpow2.f32 %v473_v1  ;;  %v469_v61 = vsub.f32 %v411_v5, %v456_v60 }
 0x1f6   :  { %999 = vpow2.f32 %v475_v47  ;;  %v466_v4 = vsub.f32 %v402_v9, %v438_v2  ;;  %v461_v62 = vrot.slane %v460_v3, 1 }
 0x1f7   :  { %v1213_v6 = vpop.eup %991  ;;  %v483_v7 = vmul.f32 1.442695, %v469_v61 }
 0x1f8   :  { %v487_v59 = vrot.slane %v1213_v6, 4  ;;  %v477_v8 = vmul.f32 1.442695, %v466_v4  ;;  %v462_v10 = vmax.f32 %v460_v3, %v461_v62 }
 0x1f9   :  { %1001 = vpow2.f32 %v483_v7 }
 0x1fa   :  { %v488_v0 = vadd.f32 %v1213_v6, %v487_v59  ;;  %1003 = vpow2.f32 %v477_v8  ;;  %v470_v11 = vsub.f32 %v414_v29, %v462_v10 }
 0x1fb   :  { %v1217_v12 = vpop.eup %993 }
 0x1fc   :  { %v1219_v15 = vpop.eup %995  ;;  %v489_v5 = vrot.slane %v488_v0, 2  ;;  %v511_v9 = vrot.slane %v1217_v12, 4  ;;  %v485_v18 = vmul.f32 1.442695, %v470_v11 }
 0x1fd   :  { %v517_v19 = vrot.slane %v1219_v15, 4 }
 0x1fe   :  { %v490_v20 = vadd.f32 %v489_v5, %v488_v0  ;;  %v512_v21 = vadd.f32 %v1217_v12, %v511_v9  ;;  %1005 = vpow2.f32 %v485_v18 }
 0x1ff   :  { %v1224_v22 = vpop.eup %997  ;;  %v518_v23 = vadd.f32 %v1219_v15, %v517_v19 }
 0x200   :  { %v1227_v24 = vpop.eup %999  ;;  %v491_v25 = vrot.slane %v490_v20, 1  ;;  %v513_v26 = vrot.slane %v512_v21, 2  ;;  %v493_v27 = vrot.slane %v1224_v22, 4 }
 0x201   :  { %v519_v29 = vrot.slane %v518_v23, 2  ;;  %v499_v30 = vrot.slane %v1227_v24, 4 }
 0x202   :  { %v492_v31 = vadd.f32 %v491_v25, %v490_v20  ;;  %v514_v32 = vadd.f32 %v513_v26, %v512_v21  ;;  %v494_v33 = vadd.f32 %v1224_v22, %v493_v27  ;;  %v1101_v21 = vmov 1966171168  }
 0x203   :  { %v1232_v34 = vpop.eup %1001  ;;  %v520_v36 = vadd.f32 %v519_v29, %v518_v23  ;;  %v500_v46 = vadd.f32 %v1227_v24, %v499_v30  ;;  %v681_v23 = vunpack.c.l.s4 %v1101_v21 }
 0x204   :  { %v1235_v48 = vpop.eup %1003  ;;  %1007 = vrcp.f32 %v492_v31  ;;  %v515_v49 = vrot.slane %v514_v32, 1  ;;  %v495_v54 = vrot.slane %v494_v33, 2  ;;  %v523_v55 = vrot.slane %v1232_v34, 4 }
 0x205   :  { %v521_v58 = vrot.slane %v520_v36, 1  ;;  %v501_v28 = vrot.slane %v500_v46, 2  ;;  %v505_v63 = vrot.slane %v1235_v48, 4 }
 0x206   :  { %v516_v37 = vadd.f32 %v515_v49, %v514_v32  ;;  %v496_v35 = vadd.f32 %v495_v54, %v494_v33  ;;  %v524_v1 = vadd.f32 %v1232_v34, %v523_v55 }
 0x207   :  { %v522_v60 = vadd.f32 %v521_v58, %v520_v36  ;;  %v502_v47 = vadd.f32 %v501_v28, %v500_v46  ;;  %v506_v2 = vadd.f32 %v1235_v48, %v505_v63  ;;  %v682_v36 = vunpack.c.0.s8 %v681_v23 }
 0x208   :  { %v1241_v3 = vpop.eup %1005  ;;  %1009 = vrcp.f32 %v516_v37  ;;  %v497_v61 = vrot.slane %v496_v35, 1  ;;  %v525_v4 = vrot.slane %v524_v1, 2 }
 0x209   :  { %1011 = vrcp.f32 %v522_v60  ;;  %v503_v62 = vrot.slane %v502_v47, 1  ;;  %v507_v7 = vrot.slane %v506_v2, 2  ;;  %v529_v59 = vrot.slane %v1241_v3, 4 }
 0x20a   :  { %v498_v8 = vadd.f32 %v497_v61, %v496_v35  ;;  %v526_v10 = vadd.f32 %v525_v4, %v524_v1  ;;  %v1253_v35 = vsub.s32 %v682_v36, %v1203_v57 }
 0x20b   :  { %v504_v0 = vadd.f32 %v503_v62, %v502_v47  ;;  %v508_v11 = vadd.f32 %v507_v7, %v506_v2  ;;  %v530_v5 = vadd.f32 %v1241_v3, %v529_v59 }
 0x20c   :  { %1013 = vrcp.f32 %v498_v8  ;;  %v527_v9 = vrot.slane %v526_v10, 1 }
 0x20d   :  { %1015 = vrcp.f32 %v504_v0  ;;  %v509_v18 = vrot.slane %v508_v11, 1  ;;  %v531_v19 = vrot.slane %v530_v5, 2 }
 0x20e   :  { %v1008_v20 = vpop.eup %1007  ;;  %v528_v25 = vadd.f32 %v527_v9, %v526_v10 }
 0x20f   :  { %v543_v26 = vmul.f32 %v1008_v20, %v1213_v6  ;;  %v532_v27 = vadd.f32 %v531_v19, %v530_v5  ;;  %v510_v29 = vadd.f32 %v509_v18, %v508_v11 }
 0x210   :  { %1017 = vrcp.f32 %v528_v25 }
 0x211   :  { %v551_v30 = vmul.f32 %v543_v26, %v1166_v38  ;;  %v552_v31 = vmul.f32 %v543_v26, %v1154_v13  ;;  %v533_v32 = vrot.slane %v532_v27, 1  ;;  %1019 = vrcp.f32 %v510_v29 }
 0x212   :  { %v1010_v33 = vpop.eup %1009 }
 0x213   :  { %v1012_v46 = vpop.eup %1011  ;;  %v567_v49 = vrot.slane %v551_v30, 4  ;;  %v573_v54 = vrot.slane %v552_v31, 4  ;;  %v547_v55 = vmul.f32 %v1010_v33, %v1217_v12  ;;  %v534_v58 = vadd.f32 %v533_v32, %v532_v27 }
 0x214   :  { %v548_v28 = vmul.f32 %v1012_v46, %v1219_v15 }
 0x215   :  { %v568_v6 = vadd.f32 %v567_v49, %v551_v30  ;;  %v574_v63 = vadd.f32 %v573_v54, %v552_v31  ;;  %v559_v37 = vmul.f32 %v547_v55, %v1170_v40  ;;  %v560_v38 = vmul.f32 %v547_v55, %v1160_v16 }
 0x216   :  { %v1014_v13 = vpop.eup %1013  ;;  %v561_v1 = vmul.f32 %v548_v28, %v1172_v41  ;;  %v562_v60 = vmul.f32 %v548_v28, %v1162_v17  ;;  %1021 = vrcp.f32 %v534_v58 }
 0x217   :  { %v1016_v12 = vpop.eup %1015  ;;  %v569_v47 = vrot.slane %v568_v6, 2  ;;  %v575_v2 = vrot.slane %v574_v63, 2  ;;  %v615_v15 = vrot.slane %v559_v37, 4  ;;  %v621_v61 = vrot.slane %v560_v38, 4 }
 0x218   :  { %v627_v4 = vrot.slane %v561_v1, 4  ;;  %v633_v62 = vrot.slane %v562_v60, 4  ;;  %v545_v40 = vmul.f32 %v1016_v12, %v1227_v24  ;;  %v544_v16 = vmul.f32 %v1014_v13, %v1224_v22 }
 0x219   :  { %v570_v7 = vadd.f32 %v569_v47, %v568_v6  ;;  %v576_v59 = vadd.f32 %v575_v2, %v574_v63  ;;  %v616_v57 = vadd.f32 %v615_v15, %v559_v37  ;;  %v622_v8 = vadd.f32 %v621_v61, %v560_v38 }
 0x21a   :  { %v628_v10 = vadd.f32 %v627_v4, %v561_v1  ;;  %v634_v41 = vadd.f32 %v633_v62, %v562_v60  ;;  %v555_v17 = vmul.f32 %v545_v40, %v1190_v50  ;;  %v556_v0 = vmul.f32 %v545_v40, %v1174_v42  ;;  %v1018_v19 = vpop.eup %1017 }
 0x21b   :  { %v571_v11 = vrot.slane %v570_v7, 1  ;;  %v577_v5 = vrot.slane %v576_v59, 1  ;;  %v617_v9 = vrot.slane %v616_v57, 2  ;;  %v623_v18 = vrot.slane %v622_v8, 2  ;;  %v1020_v29 = vpop.eup %1019 }
 0x21c   :  { %v629_v20 = vrot.slane %v628_v10, 2  ;;  %v635_v21 = vrot.slane %v634_v41, 2  ;;  %v591_v24 = vrot.slane %v555_v17, 4  ;;  %v597_v23 = vrot.slane %v556_v0, 4 }
 0x21d   :  { %v572_v22 = vadd.f32 %v571_v11, %v570_v7  ;;  %v578_v25 = vadd.f32 %v577_v5, %v576_v59  ;;  %v618_v26 = vadd.f32 %v617_v9, %v616_v57  ;;  %v624_v27 = vadd.f32 %v623_v18, %v622_v8 }
 0x21e   :  { %v630_v30 = vadd.f32 %v629_v20, %v628_v10  ;;  %v636_v31 = vadd.f32 %v635_v21, %v634_v41  ;;  %v592_v32 = vadd.f32 %v591_v24, %v555_v17  ;;  %v598_v50 = vadd.f32 %v597_v23, %v556_v0 }
 0x21f   :  { %v679_v33 = vcombine.low %v572_v22, %v578_v25  ;;  %v619_v42 = vrot.slane %v618_v26, 1  ;;  %v625_v36 = vrot.slane %v624_v27, 1  ;;  %v553_v46 = vmul.f32 %v544_v16, %v1168_v39 }
 0x220   :  { %v1022_v49 = vpop.eup %1021  ;;  %v631_v54 = vrot.slane %v630_v30, 1  ;;  %v637_v55 = vrot.slane %v636_v31, 1  ;;  %v593_v58 = vrot.slane %v592_v32, 2  ;;  %v599_v28 = vrot.slane %v598_v50, 2 }
 0x221   :  { %v1263_v6 = vrot.slane %v679_v33, %v1253_v35  ;;  %v620_v63 = vadd.f32 %v619_v42, %v618_v26  ;;  %v626_v37 = vadd.f32 %v625_v36, %v624_v27  ;;  %v554_v38 = vmul.f32 %v544_v16, %v1156_v14 }
 0x222   :  { %v632_v13 = vadd.f32 %v631_v54, %v630_v30  ;;  %v638_v1 = vadd.f32 %v637_v55, %v636_v31  ;;  %v594_v60 = vadd.f32 %v593_v58, %v592_v32  ;;  %v600_v12 = vadd.f32 %v599_v28, %v598_v50 }
 0x223   :  { %v739_v47 = vcombine.low %v620_v63, %v626_v37  ;;  %v579_v2 = vrot.slane %v553_v46, 4  ;;  %v585_v15 = vrot.slane %v554_v38, 4  ;;  %v546_v39 = vmul.f32 %v1020_v29, %v1235_v48 }
 0x224   :  { %v754_v61 = vcombine.low %v632_v13, %v638_v1  ;;  %v595_v4 = vrot.slane %v594_v60, 1  ;;  %v601_v62 = vrot.slane %v600_v12, 1  ;;  %v549_v40 = vmul.f32 %v1018_v19, %v1232_v34 }
 0x225   :  { %v1269_v7 = vrot.slane %v739_v47, %v1253_v35  ;;  %v580_v59 = vadd.f32 %v579_v2, %v553_v46  ;;  %v586_v57 = vadd.f32 %v585_v15, %v554_v38  ;;  %v557_v14 = vmul.f32 %v546_v39, %v1192_v51 }
 0x226   :  { %v1278_v8 = vrot.slane %v754_v61, %v1253_v35  ;;  %v596_v48 = vadd.f32 %v595_v4, %v594_v60  ;;  %v602_v10 = vadd.f32 %v601_v62, %v600_v12  ;;  %v558_v41 = vmul.f32 %v546_v39, %v1176_v43 }
 0x227   :  { %v581_v34 = vrot.slane %v580_v59, 2  ;;  %v587_v17 = vrot.slane %v586_v57, 2  ;;  %v603_v0 = vrot.slane %v557_v14, 4  ;;  %v563_v11 = vmul.f32 %v549_v40, %v1194_v52 }
 0x228   :  { %v709_v5 = vcombine.low %v596_v48, %v602_v10  ;;  %v609_v9 = vrot.slane %v558_v41, 4  ;;  %v564_v51 = vmul.f32 %v549_v40, %v1178_v44  ;;  %v550_v56 = vmul.f32 %v1022_v49, %v1241_v3 }
 0x229   :  { %v582_v18 = vadd.f32 %v581_v34, %v580_v59  ;;  %v588_v19 = vadd.f32 %v587_v17, %v586_v57  ;;  %v604_v20 = vadd.f32 %v603_v0, %v557_v14  ;;  %v639_v21 = vrot.slane %v563_v11, 4 }
 0x22a   :  { %v716_v24 = vrot.slane %v709_v5, %v1253_v35  ;;  %v610_v23 = vadd.f32 %v609_v9, %v558_v41  ;;  %v645_v22 = vrot.slane %v564_v51, 4  ;;  %v565_v43 = vmul.f32 %v550_v56, %v1196_v53 }
 0x22b   :  { %v583_v25 = vrot.slane %v582_v18, 1  ;;  %v589_v26 = vrot.slane %v588_v19, 1  ;;  %v605_v27 = vrot.slane %v604_v20, 2  ;;  %v640_v52 = vadd.f32 %v639_v21, %v563_v11 }
 0x22c   :  { %v611_v29 = vrot.slane %v610_v23, 2  ;;  %v646_v30 = vadd.f32 %v645_v22, %v564_v51  ;;  %v566_v44 = vmul.f32 %v550_v56, %v1180_v45  ;;  %v651_v31 = vrot.slane %v565_v43, 4 }
 0x22d   :  { %v584_v3 = vadd.f32 %v583_v25, %v582_v18  ;;  %v590_v32 = vadd.f32 %v589_v26, %v588_v19  ;;  %v606_v50 = vadd.f32 %v605_v27, %v604_v20  ;;  %v641_v33 = vrot.slane %v640_v52, 2 }
 0x22e   :  { %v612_v42 = vadd.f32 %v611_v29, %v610_v23  ;;  %v647_v36 = vrot.slane %v646_v30, 2  ;;  %v652_v46 = vadd.f32 %v651_v31, %v565_v43  ;;  %v657_v49 = vrot.slane %v566_v44, 4 }
 0x22f   :  { %v694_v54 = vcombine.low %v584_v3, %v590_v32  ;;  %v607_v55 = vrot.slane %v606_v50, 1  ;;  %v642_v53 = vadd.f32 %v641_v33, %v640_v52  ;;  %v693_v58 = vrot.slane %v1263_v6, %v1253_v35 }
 0x230   :  { %v613_v28 = vrot.slane %v612_v42, 1  ;;  %v648_v63 = vadd.f32 %v647_v36, %v646_v30  ;;  %v653_v37 = vrot.slane %v652_v46, 2  ;;  %v658_v38 = vadd.f32 %v657_v49, %v566_v44 }
 0x231   :  { %v701_v45 = vrot.slane %v694_v54, %v1253_v35  ;;  %v608_v13 = vadd.f32 %v607_v55, %v606_v50  ;;  %v643_v1 = vrot.slane %v642_v53, 1  ;;  %v723_v60 = vrot.slane %v716_v24, %v1253_v35  ;;  %811 = vst.msk [vmem:[#allocation7] sm:$0x3] %vm1273_vm0, %v693_v58 }
 0x232   :  { %v614_v12 = vadd.f32 %v613_v28, %v612_v42  ;;  %v649_v47 = vrot.slane %v648_v63, 1  ;;  %v654_v2 = vadd.f32 %v653_v37, %v652_v46  ;;  %v659_v15 = vrot.slane %v658_v38, 2 }
 0x233   :  { %v644_v39 = vadd.f32 %v643_v1, %v642_v53  ;;  %v708_v6 = vrot.slane %v701_v45, %v1253_v35  ;;  %v753_v61 = vrot.slane %v1269_v7, %v1253_v35  ;;  %v768_v4 = vrot.slane %v1278_v8, %v1253_v35  ;;  %813 = vst.msk [vmem:[#allocation7 + $0x4] sm:$0x3] %vm1273_vm0, %v723_v60 }
 0x234   :  { %v724_v62 = vcombine.low %v608_v13, %v614_v12  ;;  %v650_v40 = vadd.f32 %v649_v47, %v648_v63  ;;  %v655_v59 = vrot.slane %v654_v2, 1  ;;  %v660_v57 = vadd.f32 %v659_v15, %v658_v38 }
 0x235   :  { %812 = vst.msk [vmem:[#allocation7 + $0x2] sm:$0x3] %vm1273_vm0, %v708_v6  ;;  %815 = vst.msk [vmem:[#allocation7 + $0x8] sm:$0x3] %vm1273_vm0, %v753_v61 }
 0x236   :  { %816 = vst.msk [vmem:[#allocation7 + $0xa] sm:$0x3] %vm1273_vm0, %v768_v4  ;;  %v731_v7 = vrot.slane %v724_v62, %v1253_v35  ;;  %v769_v14 = vcombine.low %v644_v39, %v650_v40  ;;  %v656_v8 = vadd.f32 %v655_v59, %v654_v2  ;;  %v661_v48 = vrot.slane %v660_v57, 1 }
 0x238   :  { %v776_v10 = vrot.slane %v769_v14, %v1253_v35  ;;  %v662_v41 = vadd.f32 %v661_v48, %v660_v57  ;;  %v738_v34 = vrot.slane %v731_v7, %v1253_v35 }
 0x23a   :  { %v784_v17 = vcombine.low %v656_v8, %v662_v41  ;;  %v783_v0 = vrot.slane %v776_v10, %v1253_v35  ;;  %814 = vst.msk [vmem:[#allocation7 + $0x6] sm:$0x3] %vm1273_vm0, %v738_v34 }
 0x23c   :  { %v791_v11 = vrot.slane %v784_v17, %v1253_v35  ;;  %817 = vst.msk [vmem:[#allocation7 + $0xc] sm:$0x3] %vm1273_vm0, %v783_v0 }
 0x23e   :  { %v798_v5 = vrot.slane %v791_v11, %v1253_v35 }
 0x240   :  { %818 = vst.msk [vmem:[#allocation7 + $0xe] sm:$0x3] %vm1273_vm0, %v798_v5 }
 0x241   :  { %1078 = shalt.err (!%p1075_p6)
}
 0x242   :  { %s1079_s22 = scalar_lea.hbm %s1334_s4, 256 }
 0x243   :  { %p1080_p7 = scmp.ne.s32.totalorder %s1334_s4, %s1079_s22  ;;  %p1083_p8 = scmp.lt.u32.totalorder %s1079_s22, %s1334_s4 }
 0x245   :  { %p1085_p9 = pnand %p1083_p8, %p1080_p7 }
 0x247   :  { %1088 = shalt.err (!%p1085_p9)
}
 0x248   :  { %s1103_s27 = smov 32   ;;  %s1104_s28 = smov 2  }
 0x249   :  { %830 = dma.vmem_to_hbm [thread:$0]  %s825_s18, 256, %s1334_s4, [#allocation4], %s1103_s27, %s1103_s27, %s1104_s28  }
 0x24a   :  { %1093 = dma.done.wait [#allocation4], 256  }
 0x24b   :  { %1094 = vsyncadd [#allocation4], 4294967040 }
 0x24c   :  { %834 = vsyncpa [#allocation3], 1 }
 0x24d   :  { %835 = vsyncpa [#allocation6], 1 }
 0x24e   :  { %836 = vsyncpa [#allocation4], 1 }

</bundles_post_ra>
